<compile_context>
chip_gen: v7x
topology: tpu7x:2x2x1
jax: 0.10.0
libtpu: 0.0.40
codegen_flags: <defaults>
</compile_context>

<pallas_src>
import functools

import jax
import jax.numpy as jnp
from jax import lax
from jax.experimental import pallas as pl
from jax.experimental.pallas import tpu as pltpu


def _residual_block_kernel(xhp_ref, w1_ref, w2_ref, a_ref, bn_ref, alpha_ref,
                           out_ref, pad_ref, *, ksize, channels):
    K = ksize
    P = K // 2
    C = channels
    N, Hp, L = xhp_ref.shape          # L = W * C (lane dim)
    H = Hp - 2 * P
    W = L // C
    R = N * H                          # output rows
    M = N * H * W                      # elements per channel (BN population)
    inv_m = 1.0 / M
    eps = 1e-5

    def conv(xp, w_ref):
        # xp: (N, Hp, W*C).  K accumulated matmuls against banded weights.
        acc = jnp.zeros((R, L), jnp.float32)
        for kh in range(K):
            slab = xp[:, kh:kh + H, :].reshape(R, L)
            acc = acc + jnp.dot(slab, w_ref[kh],
                                preferred_element_type=jnp.float32)
        return acc

    def batchnorm(t, gamma, beta):
        # Per-lane row sums, then one matmul with kron(ones(W,W), eye(C)) folds
        # the W groups per channel and broadcasts the totals back to all lanes.
        s = jnp.sum(t, axis=0, keepdims=True)               # (1, L)
        ss = jnp.sum(t * t, axis=0, keepdims=True)          # (1, L)
        red = jnp.dot(jnp.concatenate([s, ss], axis=0), a_ref[...],
                      preferred_element_type=jnp.float32)   # (2, L)
        mean = red[0:1, :] * inv_m
        var = red[1:2, :] * inv_m - mean * mean              # biased variance
        inv = lax.rsqrt(var + eps)
        scale = gamma * inv
        shift = beta - mean * scale
        return t * scale + shift

    xhp = xhp_ref[...]

    # Zero the conv-2 pad scratch exactly once; only the halo rows must stay
    # zero, the interior is fully overwritten below.
    pad_ref[...] = jnp.zeros_like(pad_ref)

    # ---- block 1: conv -> BN -> PReLU (conv bias dropped: cancelled by BN) ----
    t = conv(xhp, w1_ref)
    t = batchnorm(t, bn_ref[0:1, :], bn_ref[1:2, :])
    alpha = alpha_ref[0]                                     # SMEM scalar
    t = jnp.where(t > 0, t, alpha * t)

    # ---- block 2: conv -> BN ----
    pad_ref[:, P:P + H, :] = t.reshape(N, H, L)
    t = conv(pad_ref[...], w2_ref)
    t = batchnorm(t, bn_ref[2:3, :], bn_ref[3:4, :])

    # ---- residual add; layout already matches the output slab ----
    x_flat = xhp[:, P:P + H, :].reshape(R, L)
    out_ref[...] = (t + x_flat).astype(out_ref.dtype)


def _banded_weights(w_oihw, width):
    """(Cout, Cin, K, K) torch conv weight -> (K, W*Cin, W*Cout) banded weights.

    Wb[kh, wp*C + ci, w*C + co] = w[co, ci, kh, wp - w + K//2]  (0 when the tap
    falls outside the kernel), so that for the row slab taken at vertical
    offset kh, `slab @ Wb[kh]` is exactly that row's contribution to the
    convolution, including the W-direction zero padding.
    """
    Cout, Cin, K, _ = w_oihw.shape
    P = K // 2
    W = width
    w_hwio = jnp.transpose(w_oihw, (2, 3, 1, 0)).astype(jnp.float32)  # (K,K,Ci,Co)
    blocks = []
    for kh in range(K):
        b = jnp.zeros((W, Cin, W, Cout), jnp.float32)
        for kw in range(K):
            dw = kw - P                             # input col wp = w + dw
            lo, hi = max(0, -dw), min(W, W - dw)    # output cols with a valid tap
            w_idx = jnp.arange(lo, hi)
            b = b.at[w_idx + dw, :, w_idx, :].set(w_hwio[kh, kw])
        blocks.append(b.reshape(W * Cin, W * Cout))
    return jnp.stack(blocks)                         # (K, W*C, W*C)


def residual_block(x_nchw, params, kernel_size):
    """Fused ResidualBlock forward.  x_nchw: (N, C, H, W) float32 -> NCHW."""
    K = kernel_size
    P = K // 2
    x = jnp.transpose(x_nchw, (0, 2, 3, 1)).astype(jnp.float32)    # NHWC
    N, H, W, C = x.shape
    L = W * C

    # H-direction zero padding only (the W padding lives in the banded
    # weights), flattened to the lane-dense (N, Hp, W*C) layout.
    xhp = jnp.pad(x, ((0, 0), (P, P), (0, 0), (0, 0))).reshape(N, H + 2 * P, L)

    # Conv biases ("b1"/"b2") are intentionally NOT passed: a per-channel bias
    # added before a batch-statistics BatchNorm is removed exactly by the mean
    # subtraction.
    w1 = _banded_weights(params["w1"], W)
    w2 = _banded_weights(params["w2"], W)

    # Channel-fold / broadcast-back matrix for the BN statistics.
    a_mat = jnp.kron(jnp.ones((W, W), jnp.float32),
                     jnp.eye(C, dtype=jnp.float32))              # (L, L)

    # gamma/beta pre-tiled to the lane layout (lane l <-> channel l % C).
    bn = jnp.stack([jnp.tile(params["gamma1"].astype(jnp.float32), W),
                    jnp.tile(params["beta1"].astype(jnp.float32), W),
                    jnp.tile(params["gamma2"].astype(jnp.float32), W),
                    jnp.tile(params["beta2"].astype(jnp.float32), W)])   # (4, L)
    alpha = params["prelu"].reshape(1).astype(jnp.float32)               # (1,)

    kernel = functools.partial(_residual_block_kernel, ksize=K, channels=C)

    out2d = pl.pallas_call(
        kernel,
        out_shape=jax.ShapeDtypeStruct((N * H, L), jnp.float32),
        in_specs=[
            pl.BlockSpec(memory_space=pltpu.MemorySpace.VMEM),   # xhp (N,Hp,W*C)
            pl.BlockSpec(memory_space=pltpu.MemorySpace.VMEM),   # w1  (K,W*C,W*C)
            pl.BlockSpec(memory_space=pltpu.MemorySpace.VMEM),   # w2  (K,W*C,W*C)
            pl.BlockSpec(memory_space=pltpu.MemorySpace.VMEM),   # A   (W*C,W*C)
            pl.BlockSpec(memory_space=pltpu.MemorySpace.VMEM),   # bn  (4,W*C)
            pl.BlockSpec(memory_space=pltpu.MemorySpace.SMEM),   # prelu alpha (1,)
        ],
        out_specs=pl.BlockSpec(memory_space=pltpu.MemorySpace.VMEM),
        scratch_shapes=[pltpu.VMEM((N, H + 2 * P, L), jnp.float32)],
    )(xhp, w1, w2, a_mat, bn, alpha)

    out = out2d.reshape(N, H, W, C)
    return jnp.transpose(out, (0, 3, 1, 2))                      # NHWC -> NCHW


def _residual_block_ref(x_nchw, params, kernel_size):
    """Pure-JAX reference matching the PyTorch training-mode forward."""
    P = kernel_size // 2

    def conv(x, w, b):
        y = lax.conv_general_dilated(
            x, w, window_strides=(1, 1), padding=((P, P), (P, P)),
            dimension_numbers=("NCHW", "OIHW", "NCHW"))
        return y + b[None, :, None, None]

    def bn(x, g, b):
        mean = jnp.mean(x, axis=(0, 2, 3), keepdims=True)
        var = jnp.mean((x - mean) ** 2, axis=(0, 2, 3), keepdims=True)  # biased
        return (x - mean) / jnp.sqrt(var + 1e-5) * g[None, :, None, None] \
               + b[None, :, None, None]

    y = bn(conv(x_nchw, params["w1"], params["b1"]),
           params["gamma1"], params["beta1"])
    a = params["prelu"][0]
    y = jnp.where(y > 0, y, a * y)
    y = bn(conv(y, params["w2"], params["b2"]),
           params["gamma2"], params["beta2"])
    return y + x_nchw


def init_params(key, channels, kernel_size):
    """Deterministic synthetic parameters matching nn.Conv2d / BN / PReLU shapes."""
    k1, k2, k3, k4, k5, k6, k7, k8 = jax.random.split(key, 8)
    fan_in = channels * kernel_size * kernel_size
    s = 1.0 / jnp.sqrt(fan_in)
    shape_w = (channels, channels, kernel_size, kernel_size)
    return {
        "w1": s * jax.random.normal(k1, shape_w, jnp.float32),
        "b1": s * jax.random.normal(k2, (channels,), jnp.float32),   # inert before batch-stat BN
        "gamma1": 1.0 + 0.1 * jax.random.normal(k3, (channels,), jnp.float32),
        "beta1": 0.1 * jax.random.normal(k4, (channels,), jnp.float32),
        "prelu": jnp.full((1,), 0.25, jnp.float32),
        "w2": s * jax.random.normal(k5, shape_w, jnp.float32),
        "b2": s * jax.random.normal(k6, (channels,), jnp.float32),   # inert before batch-stat BN
        "gamma2": 1.0 + 0.1 * jax.random.normal(k7, (channels,), jnp.float32),
        "beta2": 0.1 * jax.random.normal(k8, (channels,), jnp.float32),
    }


if __name__ == "__main__":
    kernel_size = 3
    batch, channels, spatial = 2, 8, 16   # W*C = 128 -> lane-dense layout

    key = jax.random.PRNGKey(0)
    kx, kp = jax.random.split(key)
    x = jax.random.normal(kx, (batch, channels, spatial, spatial), jnp.float32)
    params = init_params(kp, channels, kernel_size)

    out = jax.block_until_ready(residual_block(x, params, kernel_size))
    ref = jax.block_until_ready(_residual_block_ref(x, params, kernel_size))

    assert out.shape == x.shape
    assert bool(jnp.all(jnp.isfinite(out)))
    assert bool(jnp.allclose(out, ref, atol=2e-3, rtol=2e-3)), float(
        jnp.max(jnp.abs(out - ref)))
    print("KERNEL_OK")
</pallas_src>

<mosaic_0001>
module attributes {stable_mosaic.version = 11 : i64} {
  func.func @_residual_block_kernel(%arg0: memref<2x18x128xf32, #tpu.memory_space<vmem>>, %arg1: memref<3x128x128xf32, #tpu.memory_space<vmem>>, %arg2: memref<3x128x128xf32, #tpu.memory_space<vmem>>, %arg3: memref<128x128xf32, #tpu.memory_space<vmem>>, %arg4: memref<4x128xf32, #tpu.memory_space<vmem>>, %arg5: memref<1xf32, #tpu.memory_space<smem>>, %arg6: memref<32x128xf32, #tpu.memory_space<vmem>>, %arg7: memref<2x18x128xf32, #tpu.memory_space<vmem>>) attributes {dimension_semantics = [], scalar_prefetch = 0 : i64, scratch_operands = 1 : i64, tpu.core_type = #tpu.core_type<tc>} {
    %c0 = arith.constant 0 : index
    %c0_0 = arith.constant 0 : index
    %c0_1 = arith.constant 0 : index
    %0 = vector.load %arg0[%c0, %c0_0, %c0_1] : memref<2x18x128xf32, #tpu.memory_space<vmem>>, vector<2x18x128xf32>
    %cst = arith.constant 0.000000e+00 : f32
    %1 = vector.broadcast %cst : f32 to vector<2x18x128xf32>
    %c0_2 = arith.constant 0 : index
    %c0_3 = arith.constant 0 : index
    %c0_4 = arith.constant 0 : index
    %2 = vector.load %arg7[%c0_2, %c0_3, %c0_4] : memref<2x18x128xf32, #tpu.memory_space<vmem>>, vector<2x18x128xf32>
    tpu.vector_store %arg7[%c0_2, %c0_3, %c0_4], %1 {strides = array<i32>} : memref<2x18x128xf32, #tpu.memory_space<vmem>>, vector<2x18x128xf32>,
    %cst_5 = arith.constant 0.000000e+00 : f32
    %3 = vector.broadcast %cst_5 : f32 to vector<32x128xf32>
    %4 = vector.extract_strided_slice %0 {offsets = [0, 0, 0], sizes = [2, 16, 128], strides = [1, 1, 1]} : vector<2x18x128xf32> to vector<2x16x128xf32>
    %5 = vector.shape_cast %4 : vector<2x16x128xf32> to vector<32x128xf32>
    %c0_6 = arith.constant 0 : index
    %c0_7 = arith.constant 0 : index
    %c0_8 = arith.constant 0 : index
    %6 = vector.load %arg1[%c0_6, %c0_7, %c0_8] : memref<3x128x128xf32, #tpu.memory_space<vmem>>, vector<1x128x128xf32>
    %7 = vector.shape_cast %6 : vector<1x128x128xf32> to vector<128x128xf32>
    %cst_9 = arith.constant dense<0.000000e+00> : vector<32x128xf32>
    %8 = tpu.matmul %5, %7, %cst_9 {dimension_numbers = #tpu.dot_dimension_numbers<[1], [0], [0], [1], [0, 0, 1, 1], [], []>} : vector<32x128xf32>, vector<128x128xf32>, vector<32x128xf32> -> vector<32x128xf32>
    %9 = arith.addf %3, %8 : vector<32x128xf32>
    %10 = vector.extract_strided_slice %0 {offsets = [0, 1, 0], sizes = [2, 16, 128], strides = [1, 1, 1]} : vector<2x18x128xf32> to vector<2x16x128xf32>
    %11 = vector.shape_cast %10 : vector<2x16x128xf32> to vector<32x128xf32>
    %c1 = arith.constant 1 : index
    %c0_10 = arith.constant 0 : index
    %c0_11 = arith.constant 0 : index
    %12 = vector.load %arg1[%c1, %c0_10, %c0_11] : memref<3x128x128xf32, #tpu.memory_space<vmem>>, vector<1x128x128xf32>
    %13 = vector.shape_cast %12 : vector<1x128x128xf32> to vector<128x128xf32>
    %cst_12 = arith.constant dense<0.000000e+00> : vector<32x128xf32>
    %14 = tpu.matmul %11, %13, %cst_12 {dimension_numbers = #tpu.dot_dimension_numbers<[1], [0], [0], [1], [0, 0, 1, 1], [], []>} : vector<32x128xf32>, vector<128x128xf32>, vector<32x128xf32> -> vector<32x128xf32>
    %15 = arith.addf %9, %14 : vector<32x128xf32>
    %16 = vector.extract_strided_slice %0 {offsets = [0, 2, 0], sizes = [2, 16, 128], strides = [1, 1, 1]} : vector<2x18x128xf32> to vector<2x16x128xf32>
    %17 = vector.shape_cast %16 : vector<2x16x128xf32> to vector<32x128xf32>
    %c2 = arith.constant 2 : index
    %c0_13 = arith.constant 0 : index
    %c0_14 = arith.constant 0 : index
    %18 = vector.load %arg1[%c2, %c0_13, %c0_14] : memref<3x128x128xf32, #tpu.memory_space<vmem>>, vector<1x128x128xf32>
    %19 = vector.shape_cast %18 : vector<1x128x128xf32> to vector<128x128xf32>
    %cst_15 = arith.constant dense<0.000000e+00> : vector<32x128xf32>
    %20 = tpu.matmul %17, %19, %cst_15 {dimension_numbers = #tpu.dot_dimension_numbers<[1], [0], [0], [1], [0, 0, 1, 1], [], []>} : vector<32x128xf32>, vector<128x128xf32>, vector<32x128xf32> -> vector<32x128xf32>
    %21 = arith.addf %15, %20 : vector<32x128xf32>
    %c0_16 = arith.constant 0 : index
    %c0_17 = arith.constant 0 : index
    %22 = vector.load %arg4[%c0_16, %c0_17] : memref<4x128xf32, #tpu.memory_space<vmem>>, vector<1x128xf32>
    %c1_18 = arith.constant 1 : index
    %c0_19 = arith.constant 0 : index
    %23 = vector.load %arg4[%c1_18, %c0_19] : memref<4x128xf32, #tpu.memory_space<vmem>>, vector<1x128xf32>
    %cst_20 = arith.constant dense<0.000000e+00> : vector<128xf32>
    %24 = vector.multi_reduction <add>, %21, %cst_20 [0] : vector<32x128xf32> to vector<128xf32>
    %25 = vector.shape_cast %24 : vector<128xf32> to vector<1x128xf32>
    %26 = arith.mulf %21, %21 : vector<32x128xf32>
    %cst_21 = arith.constant dense<0.000000e+00> : vector<128xf32>
    %27 = vector.multi_reduction <add>, %26, %cst_21 [0] : vector<32x128xf32> to vector<128xf32>
    %28 = vector.shape_cast %27 : vector<128xf32> to vector<1x128xf32>
    %29 = tpu.concatenate %25, %28 in 0 : vector<1x128xf32>, vector<1x128xf32> -> vector<2x128xf32>
    %c0_22 = arith.constant 0 : index
    %c0_23 = arith.constant 0 : index
    %30 = vector.load %arg3[%c0_22, %c0_23] : memref<128x128xf32, #tpu.memory_space<vmem>>, vector<128x128xf32>
    %cst_24 = arith.constant dense<0.000000e+00> : vector<2x128xf32>
    %31 = tpu.matmul %29, %30, %cst_24 {dimension_numbers = #tpu.dot_dimension_numbers<[1], [0], [0], [1], [0, 0, 1, 1], [], []>} : vector<2x128xf32>, vector<128x128xf32>, vector<2x128xf32> -> vector<2x128xf32>
    %32 = vector.extract_strided_slice %31 {offsets = [0, 0], sizes = [1, 128], strides = [1, 1]} : vector<2x128xf32> to vector<1x128xf32>
    %cst_25 = arith.constant 0.001953125 : f32
    %33 = vector.broadcast %cst_25 : f32 to vector<1x128xf32>
    %34 = arith.mulf %32, %33 : vector<1x128xf32>
    %35 = vector.extract_strided_slice %31 {offsets = [1, 0], sizes = [1, 128], strides = [1, 1]} : vector<2x128xf32> to vector<1x128xf32>
    %cst_26 = arith.constant 0.001953125 : f32
    %36 = vector.broadcast %cst_26 : f32 to vector<1x128xf32>
    %37 = arith.mulf %35, %36 : vector<1x128xf32>
    %38 = arith.mulf %34, %34 : vector<1x128xf32>
    %39 = arith.subf %37, %38 : vector<1x128xf32>
    %cst_27 = arith.constant 9.99999974E-6 : f32
    %40 = vector.broadcast %cst_27 : f32 to vector<1x128xf32>
    %41 = arith.addf %39, %40 : vector<1x128xf32>
    %42 = math.rsqrt %41 : vector<1x128xf32>
    %43 = arith.mulf %22, %42 : vector<1x128xf32>
    %44 = arith.mulf %34, %43 : vector<1x128xf32>
    %45 = arith.subf %23, %44 : vector<1x128xf32>
    %46 = vector.broadcast %43 : vector<1x128xf32> to vector<32x128xf32>
    %47 = arith.mulf %21, %46 : vector<32x128xf32>
    %48 = vector.broadcast %45 : vector<1x128xf32> to vector<32x128xf32>
    %49 = arith.addf %47, %48 : vector<32x128xf32>
    %c0_28 = arith.constant 0 : index
    %50 = memref.load %arg5[%c0_28] : memref<1xf32, #tpu.memory_space<smem>>
    %cst_29 = arith.constant 0.000000e+00 : f32
    %51 = vector.broadcast %cst_29 : f32 to vector<32x128xf32>
    %52 = arith.cmpf ogt, %49, %51 : vector<32x128xf32>
    %53 = vector.broadcast %50 : f32 to vector<32x128xf32>
    %54 = arith.mulf %53, %49 : vector<32x128xf32>
    %55 = arith.select %52, %49, %54 : vector<32x128xi1>, vector<32x128xf32>
    %56 = vector.shape_cast %55 : vector<32x128xf32> to vector<2x16x128xf32>
    %c0_30 = arith.constant 0 : index
    %c1_31 = arith.constant 1 : index
    %c0_32 = arith.constant 0 : index
    %57 = vector.load %arg7[%c0_30, %c1_31, %c0_32] : memref<2x18x128xf32, #tpu.memory_space<vmem>>, vector<2x16x128xf32>
    tpu.vector_store %arg7[%c0_30, %c1_31, %c0_32], %56 {strides = array<i32>} : memref<2x18x128xf32, #tpu.memory_space<vmem>>, vector<2x16x128xf32>,
    %c0_33 = arith.constant 0 : index
    %c0_34 = arith.constant 0 : index
    %c0_35 = arith.constant 0 : index
    %58 = vector.load %arg7[%c0_33, %c0_34, %c0_35] : memref<2x18x128xf32, #tpu.memory_space<vmem>>, vector<2x18x128xf32>
    %cst_36 = arith.constant 0.000000e+00 : f32
    %59 = vector.broadcast %cst_36 : f32 to vector<32x128xf32>
    %60 = vector.extract_strided_slice %58 {offsets = [0, 0, 0], sizes = [2, 16, 128], strides = [1, 1, 1]} : vector<2x18x128xf32> to vector<2x16x128xf32>
    %61 = vector.shape_cast %60 : vector<2x16x128xf32> to vector<32x128xf32>
    %c0_37 = arith.constant 0 : index
    %c0_38 = arith.constant 0 : index
    %c0_39 = arith.constant 0 : index
    %62 = vector.load %arg2[%c0_37, %c0_38, %c0_39] : memref<3x128x128xf32, #tpu.memory_space<vmem>>, vector<1x128x128xf32>
    %63 = vector.shape_cast %62 : vector<1x128x128xf32> to vector<128x128xf32>
    %cst_40 = arith.constant dense<0.000000e+00> : vector<32x128xf32>
    %64 = tpu.matmul %61, %63, %cst_40 {dimension_numbers = #tpu.dot_dimension_numbers<[1], [0], [0], [1], [0, 0, 1, 1], [], []>} : vector<32x128xf32>, vector<128x128xf32>, vector<32x128xf32> -> vector<32x128xf32>
    %65 = arith.addf %59, %64 : vector<32x128xf32>
    %66 = vector.extract_strided_slice %58 {offsets = [0, 1, 0], sizes = [2, 16, 128], strides = [1, 1, 1]} : vector<2x18x128xf32> to vector<2x16x128xf32>
    %67 = vector.shape_cast %66 : vector<2x16x128xf32> to vector<32x128xf32>
    %c1_41 = arith.constant 1 : index
    %c0_42 = arith.constant 0 : index
    %c0_43 = arith.constant 0 : index
    %68 = vector.load %arg2[%c1_41, %c0_42, %c0_43] : memref<3x128x128xf32, #tpu.memory_space<vmem>>, vector<1x128x128xf32>
    %69 = vector.shape_cast %68 : vector<1x128x128xf32> to vector<128x128xf32>
    %cst_44 = arith.constant dense<0.000000e+00> : vector<32x128xf32>
    %70 = tpu.matmul %67, %69, %cst_44 {dimension_numbers = #tpu.dot_dimension_numbers<[1], [0], [0], [1], [0, 0, 1, 1], [], []>} : vector<32x128xf32>, vector<128x128xf32>, vector<32x128xf32> -> vector<32x128xf32>
    %71 = arith.addf %65, %70 : vector<32x128xf32>
    %72 = vector.extract_strided_slice %58 {offsets = [0, 2, 0], sizes = [2, 16, 128], strides = [1, 1, 1]} : vector<2x18x128xf32> to vector<2x16x128xf32>
    %73 = vector.shape_cast %72 : vector<2x16x128xf32> to vector<32x128xf32>
    %c2_45 = arith.constant 2 : index
    %c0_46 = arith.constant 0 : index
    %c0_47 = arith.constant 0 : index
    %74 = vector.load %arg2[%c2_45, %c0_46, %c0_47] : memref<3x128x128xf32, #tpu.memory_space<vmem>>, vector<1x128x128xf32>
    %75 = vector.shape_cast %74 : vector<1x128x128xf32> to vector<128x128xf32>
    %cst_48 = arith.constant dense<0.000000e+00> : vector<32x128xf32>
    %76 = tpu.matmul %73, %75, %cst_48 {dimension_numbers = #tpu.dot_dimension_numbers<[1], [0], [0], [1], [0, 0, 1, 1], [], []>} : vector<32x128xf32>, vector<128x128xf32>, vector<32x128xf32> -> vector<32x128xf32>
    %77 = arith.addf %71, %76 : vector<32x128xf32>
    %c2_49 = arith.constant 2 : index
    %c0_50 = arith.constant 0 : index
    %78 = vector.load %arg4[%c2_49, %c0_50] : memref<4x128xf32, #tpu.memory_space<vmem>>, vector<1x128xf32>
    %c3 = arith.constant 3 : index
    %c0_51 = arith.constant 0 : index
    %79 = vector.load %arg4[%c3, %c0_51] : memref<4x128xf32, #tpu.memory_space<vmem>>, vector<1x128xf32>
    %cst_52 = arith.constant dense<0.000000e+00> : vector<128xf32>
    %80 = vector.multi_reduction <add>, %77, %cst_52 [0] : vector<32x128xf32> to vector<128xf32>
    %81 = vector.shape_cast %80 : vector<128xf32> to vector<1x128xf32>
    %82 = arith.mulf %77, %77 : vector<32x128xf32>
    %cst_53 = arith.constant dense<0.000000e+00> : vector<128xf32>
    %83 = vector.multi_reduction <add>, %82, %cst_53 [0] : vector<32x128xf32> to vector<128xf32>
    %84 = vector.shape_cast %83 : vector<128xf32> to vector<1x128xf32>
    %85 = tpu.concatenate %81, %84 in 0 : vector<1x128xf32>, vector<1x128xf32> -> vector<2x128xf32>
    %c0_54 = arith.constant 0 : index
    %c0_55 = arith.constant 0 : index
    %86 = vector.load %arg3[%c0_54, %c0_55] : memref<128x128xf32, #tpu.memory_space<vmem>>, vector<128x128xf32>
    %cst_56 = arith.constant dense<0.000000e+00> : vector<2x128xf32>
    %87 = tpu.matmul %85, %86, %cst_56 {dimension_numbers = #tpu.dot_dimension_numbers<[1], [0], [0], [1], [0, 0, 1, 1], [], []>} : vector<2x128xf32>, vector<128x128xf32>, vector<2x128xf32> -> vector<2x128xf32>
    %88 = vector.extract_strided_slice %87 {offsets = [0, 0], sizes = [1, 128], strides = [1, 1]} : vector<2x128xf32> to vector<1x128xf32>
    %cst_57 = arith.constant 0.001953125 : f32
    %89 = vector.broadcast %cst_57 : f32 to vector<1x128xf32>
    %90 = arith.mulf %88, %89 : vector<1x128xf32>
    %91 = vector.extract_strided_slice %87 {offsets = [1, 0], sizes = [1, 128], strides = [1, 1]} : vector<2x128xf32> to vector<1x128xf32>
    %cst_58 = arith.constant 0.001953125 : f32
    %92 = vector.broadcast %cst_58 : f32 to vector<1x128xf32>
    %93 = arith.mulf %91, %92 : vector<1x128xf32>
    %94 = arith.mulf %90, %90 : vector<1x128xf32>
    %95 = arith.subf %93, %94 : vector<1x128xf32>
    %cst_59 = arith.constant 9.99999974E-6 : f32
    %96 = vector.broadcast %cst_59 : f32 to vector<1x128xf32>
    %97 = arith.addf %95, %96 : vector<1x128xf32>
    %98 = math.rsqrt %97 : vector<1x128xf32>
    %99 = arith.mulf %78, %98 : vector<1x128xf32>
    %100 = arith.mulf %90, %99 : vector<1x128xf32>
    %101 = arith.subf %79, %100 : vector<1x128xf32>
    %102 = vector.broadcast %99 : vector<1x128xf32> to vector<32x128xf32>
    %103 = arith.mulf %77, %102 : vector<32x128xf32>
    %104 = vector.broadcast %101 : vector<1x128xf32> to vector<32x128xf32>
    %105 = arith.addf %103, %104 : vector<32x128xf32>
    %106 = vector.extract_strided_slice %0 {offsets = [0, 1, 0], sizes = [2, 16, 128], strides = [1, 1, 1]} : vector<2x18x128xf32> to vector<2x16x128xf32>
    %107 = vector.shape_cast %106 : vector<2x16x128xf32> to vector<32x128xf32>
    %108 = arith.addf %105, %107 : vector<32x128xf32>
    %c0_60 = arith.constant 0 : index
    %c0_61 = arith.constant 0 : index
    %109 = vector.load %arg6[%c0_60, %c0_61] : memref<32x128xf32, #tpu.memory_space<vmem>>, vector<32x128xf32>
    tpu.vector_store %arg6[%c0_60, %c0_61], %108 {strides = array<i32>} : memref<32x128xf32, #tpu.memory_space<vmem>>, vector<32x128xf32>,
    return
  }
}

</mosaic_0001>

<bundles_post_ra>
// kernel: tpu_custom_call.1
= control target key start
LH: loop header
LB: loop body
LE: loop exit
PB: predicated region body
PF: predicated region fallthrough
CT: control target
= control target key end

     0   :  { %12 = vsyncpa [#allocation5], 0  ;;  %s2210_s0 = inlined_call_operand.vmem [shape: f32[2,18,128], index: 0, kind: input, shape index: {}]   ;;  %s2211_s1 = inlined_call_operand.hbm [shape: f32[3,128,128], index: 1, kind: input, shape index: {}]   ;;  %s2212_s2 = inlined_call_operand.hbm [shape: f32[3,128,128], index: 2, kind: input, shape index: {}]   ;;  %s2213_s3 = inlined_call_operand.hbm [shape: f32[128,128], index: 3, kind: input, shape index: {}]   ;;  %s2214_s4 = inlined_call_operand.vmem [shape: f32[4,128], index: 4, kind: input, shape index: {}]   ;;  %s2215_s5 = inlined_call_operand.<no memory space> [shape: f32[1], index: 5, kind: input, shape index: {}]   ;;  %s2216_s6 = inlined_call_operand.hbm [shape: f32[32,128], index: 6, kind: output, shape index: {}]  }
   0x1   :  { %13 = vsyncpa [#allocation8], 0 }
   0x2   :  { %14 = vsyncpa [#allocation6], 0  ;;  %s1914_s21 = smov [#allocation7]   ;;  %s1915_s23 = smov [#allocation4]  }
   0x3   :  { %s34_s22 = sshll.u32 %s1914_s21, 4  ;;  %s22_s24 = sshll.u32 %s1915_s23, 4  ;;  %s35_s22 = int_to_ptr.vmem [resolvable:$true] %s34_s22  ;;  %s1958_s24 = int_to_ptr.vmem [resolvable:$true] %s22_s24 }
   0x4   :  { %s1820_s27 = scalar_lea.hbm %s2212_s2, 6144 }
   0x5   :  { %p1821_p0 = scmp.ne.s32.totalorder %s2212_s2, %s1820_s27  ;;  %p1824_p1 = scmp.lt.u32.totalorder %s1820_s27, %s2212_s2 }
   0x7   :  { %p1826_p2 = pnand %p1824_p1, %p1821_p0 }
   0x9   :  { %1829 = shalt.err (!%p1826_p2)
}
   0xa   :  { %s1830_s8 = scalar_lea.vmem %s35_s22, 6144  ;;  %p1835_p4 = scmp.lt.s32.totalorder %s35_s22, %s35_s22 }
   0xb   :  { %p1831_p3 = scmp.ne.s32.totalorder %s35_s22, %s1830_s8  ;;  %p1836_p5 = scmp.lt.s32.totalorder %s1830_s8, %s1830_s8 }
   0xd   :  { %p1837_p6 = por %p1836_p5, %p1835_p4 }
   0xf   :  { %p1838_p7 = pnand %p1837_p6, %p1831_p3 }
  0x11   :  { %1841 = shalt.err (!%p1838_p7)
}
  0x12   :  { %s1916_s9 = smov 128   ;;  %s1917_s10 = smov 8  }
  0x13   :  { %40 = dma.hbm_to_vmem [thread:$0]  %s2212_s2, 6144, %s35_s22, [#allocation8], %s1916_s9, %s1916_s9, %s1917_s10  }
  0x14   :  { %s1842_s15 = scalar_lea.hbm %s2211_s1, 6144 }
  0x15   :  { %p1843_p8 = scmp.ne.s32.totalorder %s2211_s1, %s1842_s15  ;;  %p1846_p9 = scmp.lt.u32.totalorder %s1842_s15, %s2211_s1 }
  0x17   :  { %p1848_p10 = pnand %p1846_p9, %p1843_p8 }
  0x19   :  { %1851 = shalt.err (!%p1848_p10)
}
  0x1a   :  { %s1852_s20 = scalar_lea.vmem %s1958_s24, 6144  ;;  %p1857_p12 = scmp.lt.s32.totalorder %s1958_s24, %s1958_s24 }
  0x1b   :  { %p1853_p11 = scmp.ne.s32.totalorder %s1958_s24, %s1852_s20  ;;  %p1858_p13 = scmp.lt.s32.totalorder %s1852_s20, %s1852_s20 }
  0x1d   :  { %p1859_p0 = por %p1858_p13, %p1857_p12 }
  0x1f   :  { %p1860_p1 = pnand %p1859_p0, %p1853_p11 }
  0x21   :  { %1863 = shalt.err (!%p1860_p1)
}
  0x22   :  { %28 = dma.hbm_to_vmem [thread:$0]  %s2211_s1, 6144, %s1958_s24, [#allocation5], %s1916_s9, %s1916_s9, %s1917_s10  }
  0x23   :  { %s1918_s22 = smov [#allocation9]   ;;  %s1864_s27 = scalar_lea.hbm %s2213_s3, 2048 }
  0x24   :  { %s46_s23 = sshll.u32 %s1918_s22, 4  ;;  %p1865_p2 = scmp.ne.s32.totalorder %s2213_s3, %s1864_s27  ;;  %s47_s23 = int_to_ptr.vmem [resolvable:$true] %s46_s23 }
  0x25   :  { %p1868_p3 = scmp.lt.u32.totalorder %s1864_s27, %s2213_s3 }
  0x27   :  { %p1870_p4 = pnand %p1868_p3, %p1865_p2 }
  0x29   :  { %1873 = shalt.err (!%p1870_p4)
}
  0x2a   :  { %s1874_s8 = scalar_lea.vmem %s47_s23, 2048  ;;  %p1879_p6 = scmp.lt.s32.totalorder %s47_s23, %s47_s23 }
  0x2b   :  { %p1875_p5 = scmp.ne.s32.totalorder %s47_s23, %s1874_s8  ;;  %p1880_p7 = scmp.lt.s32.totalorder %s1874_s8, %s1874_s8 }
  0x2d   :  { %p1881_p8 = por %p1880_p7, %p1879_p6 }
  0x2f   :  { %p1882_p9 = pnand %p1881_p8, %p1875_p5 }
  0x31   :  { %1885 = shalt.err (!%p1882_p9)
}
  0x32   :  { %52 = dma.hbm_to_vmem [thread:$0]  %s2213_s3, 2048, %s47_s23, [#allocation8], %s1916_s9, %s1916_s9, %s1917_s10  }
  0x33   :  { %1908 = dma.done.wait [#allocation5], 6144  }
  0x34   :  { %1909 = vsyncadd [#allocation5], 4294961152 }
  0x35   :  { %1910 = dma.done.wait [#allocation8], 8192  }
  0x36   :  { %1911 = vsyncadd [#allocation8], 4294959104  ;;  %v1919_v0 = vmov 0.0|0.0   ;;  %v116_v1 = vld [vmem:[#allocation4 + $0x80] sm:$0xff]  ;;  %v117_v2 = vld [vmem:[#allocation4 + $0x88] sm:$0xff]  ;;  %vm100_vm0 = vcmask 1046528  }
  0x37   :  { %1647 = vmatprep.subr.bf16.mxu1 %v1919_v0  ;;  %v118_v3 = vld [vmem:[#allocation4 + $0x90] sm:$0xff]  ;;  %v1551_v4 = vpack.c.bf16 %v117_v2, %v116_v1  ;;  %v119_v5 = vld [vmem:[#allocation4 + $0x98] sm:$0xff]  ;;  %v120_v7 = vld [vmem:[#allocation4 + $0xa0] sm:$0xff]  ;;  %vm302_vm1 = vcmask 1045504   ;;  %vm1920_vm2 = vmmov 0   ;;  %vm447_vm3 = vcmask 1040384  }
  0x38   :  { %v1555_v6 = vpack.c.bf16 %v119_v5, %v118_v3  ;;  %v121_v8 = vld [vmem:[#allocation4 + $0xa8] sm:$0xff]  ;;  %v2014_v10 = vld [vmem:[%s2210_s0] sm:$0xff]  ;;  %v2019_v11 = vld [vmem:[%s2210_s0 + $0x8] sm:$0xff]  ;;  %s1922_s30 = smov [#allocation10]  }
  0x39   :  { %1552 = vmatprep.subr.bf16.mxu0 %v1551_v4  ;;  %v1559_v9 = vpack.c.bf16 %v121_v8, %v120_v7  ;;  %v122_v12 = vld [vmem:[#allocation4 + $0xb0] sm:$0xff]  ;;  %v123_v13 = vld [vmem:[#allocation4 + $0xb8] sm:$0xff]  ;;  %v101_v14 = vrot.slane %v2014_v10, 1  ;;  %v102_v15 = vrot.slane %v2019_v11, 1  ;;  %v124_v18 = vld [vmem:[#allocation4 + $0xc0] sm:$0xff]  ;;  %s1086_s7 = sshll.u32 %s1922_s30, 4  ;;  %s1087_s7 = int_to_ptr.vmem [resolvable:$true] %s1086_s7 }
  0x3a   :  { %1554 = vmatpush3.bf16.msra.mxu0 %v1551_v4  ;;  %v1563_v17 = vpack.c.bf16 %v123_v13, %v122_v12  ;;  %v125_v19 = vld [vmem:[#allocation4 + $0xc8] sm:$0xff]  ;;  %v2035_v21 = vld [vmem:[%s2210_s0 + $0x20] sm:$0xff]  ;;  %v71_v23 = vld [vmem:[%s2210_s0 + $0x28] sm:$0x3]  ;;  %p1891_p11 = scmp.lt.s32.totalorder %s1087_s7, %s1087_s7 }
  0x3b   :  { %1556 = vmatprep.subr.bf16.mxu0 %v1555_v6  ;;  %v2024_v16 = vsel %vm100_vm0, %v101_v14, %v102_v15  ;;  %v2030_v20 = vld [vmem:[%s2210_s0 + $0x18] sm:$0xff]  ;;  %v1567_v22 = vpack.c.bf16 %v125_v19, %v124_v18  ;;  %v309_v25 = vrot.slane %v2035_v21, 2  ;;  %v126_v26 = vld [vmem:[#allocation4 + $0xd0] sm:$0xff]  ;;  %v127_v27 = vld [vmem:[#allocation4 + $0xd8] sm:$0xff]  ;;  %v311_v28 = vrot.slane %v71_v23, 2 }
  0x3c   :  { %1285 = vmatprep.mubr.f32.mxu0 %v2024_v16  ;;  %v308_v24 = vrot.slane %v2030_v20, 2  ;;  %v1571_v31 = vpack.c.bf16 %v127_v27, %v126_v26  ;;  %v128_v32 = vld [vmem:[#allocation4 + $0xe0] sm:$0xff]  ;;  %v129_v33 = vld [vmem:[#allocation4 + $0xe8] sm:$0xff]  ;;  %v451_v36 = vld [vmem:[#allocation9 + $0x10] sm:$0xff]  ;;  %v106_v49 = vrot.slane %v2030_v20, 1  ;;  %v107_v50 = vrot.slane %v2035_v21, 1 }
  0x3d   :  { %v2046_v30 = vsel %vm302_vm1, %v309_v25, %v311_v28  ;;  %v449_v34 = vld [vmem:[#allocation9] sm:$0xff]  ;;  %v450_v35 = vld [vmem:[#allocation9 + $0x8] sm:$0xff]  ;;  %v452_v38 = vld [vmem:[#allocation9 + $0x18] sm:$0xff]  ;;  %v1575_v39 = vpack.c.bf16 %v129_v33, %v128_v32  ;;  %v109_v54 = vrot.slane %v71_v23, 1 }
  0x3e   :  { %1558 = vmatpush3.bf16.msra.mxu0 %v1555_v6  ;;  %v2043_v29 = vsel %vm302_vm1, %v308_v24, %v309_v25  ;;  %v2048_v37 = vpack.c.bf16 %v450_v35, %v449_v34  ;;  %v2051_v40 = vpack.c.bf16 %v452_v38, %v451_v36  ;;  %v130_v41 = vld [vmem:[#allocation4 + $0xf0] sm:$0xff]  ;;  %v131_v42 = vld [vmem:[#allocation4 + $0xf8] sm:$0xff]  ;;  %v2057_v44 = vld [vmem:[%s2210_s0 + $0x10] sm:$0x3]  ;;  %v2068_v56 = vsel %vm100_vm0, %v106_v49, %v107_v50 }
  0x3f   :  { %1560 = vmatprep.subr.bf16.mxu0 %v1559_v9  ;;  %v1579_v43 = vpack.c.bf16 %v131_v42, %v130_v41  ;;  %v78_v45 = vld [vmem:[#allocation4] sm:$0xff]  ;;  %v79_v46 = vld [vmem:[#allocation4 + $0x8] sm:$0xff]  ;;  %v104_v47 = vrot.slane %v2057_v44, 1  ;;  %v80_v51 = vld [vmem:[#allocation4 + $0x10] sm:$0xff]  ;;  %v2073_v59 = vsel %vm100_vm0, %v107_v50, %v109_v54  ;;  %v303_v24 = vrot.slane %v2014_v10, 2 }
  0x40   :  { %1649 = vmatpush3.bf16.msra.mxu1 %v2048_v37  ;;  %v1583_v48 = vpack.c.bf16 %v79_v46, %v78_v45  ;;  %v81_v52 = vld [vmem:[#allocation4 + $0x18] sm:$0xff]  ;;  %v82_v57 = vld [vmem:[#allocation4 + $0x20] sm:$0xff]  ;;  %v83_v58 = vld [vmem:[#allocation4 + $0x28] sm:$0xff]  ;;  %v304_v25 = vrot.slane %v2019_v11, 2  ;;  %v306_v46 = vrot.slane %v2057_v44, 2 }
  0x41   :  { %1650 = vmatprep.subr.bf16.mxu1 %v1919_v0  ;;  %v2065_v53 = vsel %vm100_vm0, %v102_v15, %v104_v47  ;;  %v1587_v55 = vpack.c.bf16 %v81_v52, %v80_v51  ;;  %v1591_v60 = vpack.c.bf16 %v83_v58, %v82_v57  ;;  %v84_v61 = vld [vmem:[#allocation4 + $0x30] sm:$0xff]  ;;  %v85_v62 = vld [vmem:[#allocation4 + $0x38] sm:$0xff]  ;;  %v86_v1 = vld [vmem:[#allocation4 + $0x40] sm:$0xff] }
  0x42   :  { %1562 = vmatpush3.bf16.msra.mxu0 %v1559_v9  ;;  %v1595_v63 = vpack.c.bf16 %v85_v62, %v84_v61  ;;  %v87_v2 = vld [vmem:[#allocation4 + $0x48] sm:$0xff]  ;;  %v88_v4 = vld [vmem:[#allocation4 + $0x50] sm:$0xff]  ;;  %v89_v5 = vld [vmem:[#allocation4 + $0x58] sm:$0xff]  ;;  %v307_v47 = vsel %vm302_vm1, %v304_v25, %v306_v46 }
  0x43   :  { %1564 = vmatprep.subr.bf16.mxu0 %v1563_v17  ;;  %v1599_v3 = vpack.c.bf16 %v87_v2, %v86_v1  ;;  %v1603_v6 = vpack.c.bf16 %v89_v5, %v88_v4  ;;  %v90_v7 = vld [vmem:[#allocation4 + $0x60] sm:$0xff]  ;;  %v91_v8 = vld [vmem:[#allocation4 + $0x68] sm:$0xff]  ;;  %v92_v12 = vld [vmem:[#allocation4 + $0x70] sm:$0xff] }
  0x44   :  { %1652 = vmatpush3.bf16.msra.mxu1 %v2051_v40  ;;  %v1607_v9 = vpack.c.bf16 %v91_v8, %v90_v7  ;;  %v93_v13 = vld [vmem:[#allocation4 + $0x78] sm:$0xff]  ;;  %v318_v15 = vld [vmem:[#allocation4 + $0x100] sm:$0xff]  ;;  %v320_v19 = vld [vmem:[#allocation4 + $0x110] sm:$0xff] }
  0x45   :  { %1653 = vmatprep.subr.bf16.mxu1 %v1919_v0  ;;  %v1611_v14 = vpack.c.bf16 %v93_v13, %v92_v12  ;;  %v322_v26 = vld [vmem:[#allocation4 + $0x120] sm:$0xff]  ;;  %v323_v27 = vld [vmem:[#allocation4 + $0x128] sm:$0xff]  ;;  %v324_v32 = vld [vmem:[#allocation4 + $0x130] sm:$0xff] }
  0x46   :  { %1566 = vmatpush3.bf16.msra.mxu0 %v1563_v17  ;;  %v319_v17 = vld [vmem:[#allocation4 + $0x108] sm:$0xff]  ;;  %v1623_v28 = vpack.c.bf16 %v323_v27, %v322_v26  ;;  %v325_v33 = vld [vmem:[#allocation4 + $0x138] sm:$0xff]  ;;  %v326_v34 = vld [vmem:[#allocation4 + $0x140] sm:$0xff] }
  0x47   :  { %1568 = vmatprep.subr.bf16.mxu0 %v1567_v22  ;;  %v1615_v18 = vpack.c.bf16 %v319_v17, %v318_v15  ;;  %v327_v35 = vld [vmem:[#allocation4 + $0x148] sm:$0xff]  ;;  %v328_v36 = vld [vmem:[#allocation4 + $0x150] sm:$0xff]  ;;  %v329_v38 = vld [vmem:[#allocation4 + $0x158] sm:$0xff] }
  0x48   :  { %v331_v41 = vld [vmem:[#allocation4 + $0x168] sm:$0xff]  ;;  %v453_v44 = vld [vmem:[#allocation9 + $0x20] sm:$0xff]  ;;  %v455_v50 = vld [vmem:[#allocation9 + $0x30] sm:$0xff] }
  0x49   :  { %v456_v51 = vld [vmem:[#allocation9 + $0x38] sm:$0xff]  ;;  %v459_v52 = vld [vmem:[#allocation9 + $0x50] sm:$0xff]  ;;  %v461_v57 = vld [vmem:[#allocation9 + $0x60] sm:$0xff] }
  0x4a   :  { %1570 = vmatpush3.bf16.msra.mxu0 %v1567_v22  ;;  %v321_v22 = vld [vmem:[#allocation4 + $0x118] sm:$0xff]  ;;  %v462_v58 = vld [vmem:[#allocation9 + $0x68] sm:$0xff]  ;;  %v463_v61 = vld [vmem:[#allocation9 + $0x70] sm:$0xff] }
  0x4b   :  { %1572 = vmatprep.subr.bf16.mxu0 %v1571_v31  ;;  %v1619_v23 = vpack.c.bf16 %v321_v22, %v320_v19  ;;  %v460_v54 = vld [vmem:[#allocation9 + $0x58] sm:$0xff]  ;;  %v634_v46 = vld [vmem:[#allocation7 + $0xc0] sm:$0xff] }
  0x4c   :  { %v464_v62 = vld [vmem:[#allocation9 + $0x78] sm:$0xff] }
  0x4d   :  { %v1669_v1 = vpack.c.bf16 %v464_v62, %v463_v61 }
  0x4e   :  { %1574 = vmatpush3.bf16.msra.mxu0 %v1571_v31  ;;  %v305_v31 = vsel %vm302_vm1, %v303_v24, %v304_v25 }
  0x4f   :  { %1576 = vmatprep.subr.bf16.mxu0 %v1575_v39 }
  0x52   :  { %1578 = vmatpush3.bf16.msra.mxu0 %v1575_v39  ;;  %v330_v39 = vld [vmem:[#allocation4 + $0x160] sm:$0xff] }
  0x53   :  { %1580 = vmatprep.subr.bf16.mxu0 %v1579_v43  ;;  %v1639_v42 = vpack.c.bf16 %v331_v41, %v330_v39  ;;  %v630_v39 = vld [vmem:[#allocation7 + $0xa0] sm:$0xff]  ;;  %v631_v41 = vld [vmem:[#allocation7 + $0xa8] sm:$0xff] }
  0x56   :  { %1582 = vmatpush3.bf16.msra.mxu0 %v1579_v43  ;;  %v333_v43 = vld [vmem:[#allocation4 + $0x178] sm:$0xff] }
  0x57   :  { %1584 = vmatprep.subr.bf16.mxu0 %v1583_v48 }
  0x59   :  { %1286 = vmatmul.mubr.f32.vlgmr.msra.gmra.mrb[0].mxu0 %v2065_v53 }
  0x5a   :  { %1586 = vmatpush3.bf16.msra.mxu0 %v1583_v48  ;;  %1288 = vmatprep.mubr.f32.mxu0 %v2068_v56  ;;  %v454_v48 = vld [vmem:[#allocation9 + $0x28] sm:$0xff] }
  0x5b   :  { %1588 = vmatprep.subr.bf16.mxu0 %v1587_v55  ;;  %v1654_v49 = vpack.c.bf16 %v454_v48, %v453_v44  ;;  %v636_v48 = vld [vmem:[#allocation7 + $0xd0] sm:$0xff] }
  0x5d   :  { %1289 = vmatmul.mubr.f32.gmra.mrb[2].mxu0 %v2073_v59  ;;  %1655 = vmatpush3.bf16.msra.mxu1 %v1654_v49 }
  0x5e   :  { %1590 = vmatpush3.bf16.msra.mxu0 %v1587_v55  ;;  %1323 = vmatprep.mubr.f32.mxu0 %v2014_v10  ;;  %v1627_v10 = vpack.c.bf16 %v325_v33, %v324_v32  ;;  %v1663_v55 = vpack.c.bf16 %v460_v54, %v459_v52  ;;  %v589_v54 = vld [vmem:[#allocation7] sm:$0xff] }
  0x5f   :  { %1592 = vmatprep.subr.bf16.mxu0 %v1591_v60  ;;  %1656 = vmatprep.subr.bf16.mxu1 %v1919_v0 }
  0x62   :  { %1594 = vmatpush3.bf16.msra.mxu0 %v1591_v60  ;;  %v1666_v60 = vpack.c.bf16 %v462_v58, %v461_v57 }
  0x63   :  { %1596 = vmatprep.subr.bf16.mxu0 %v1595_v63 }
  0x66   :  { %1598 = vmatpush3.bf16.msra.mxu0 %v1595_v63  ;;  %v1921_v63 = vmov 0.0  }
  0x67   :  { %1600 = vmatprep.subr.bf16.mxu0 %v1599_v3  ;;  %1399 = vmatprep.mubr.msk.f32.mxu1 %vm1920_vm2, %v1921_v63  ;;  %72 = vst [vmem:[#allocation2] sm:$0xff] %v1921_v63  ;;  %73 = vst [vmem:[#allocation2 + $0x8] sm:$0xff] %v1921_v63 }
  0x68   :  { %74 = vst [vmem:[#allocation2 + $0x10] sm:$0x3] %v1921_v63  ;;  %75 = vst [vmem:[#allocation2 + $0x18] sm:$0xff] %v1921_v63 }
  0x69   :  { %76 = vst [vmem:[#allocation2 + $0x20] sm:$0xff] %v1921_v63  ;;  %77 = vst [vmem:[#allocation2 + $0x28] sm:$0x3] %v1921_v63 }
  0x6a   :  { %1602 = vmatpush3.bf16.msra.mxu0 %v1599_v3 }
  0x6b   :  { %1604 = vmatprep.subr.bf16.mxu0 %v1603_v6 }
  0x6e   :  { %1606 = vmatpush3.bf16.msra.mxu0 %v1603_v6 }
  0x6f   :  { %1608 = vmatprep.subr.bf16.mxu0 %v1607_v9 }
  0x72   :  { %1610 = vmatpush3.bf16.msra.mxu0 %v1607_v9 }
  0x73   :  { %1612 = vmatprep.subr.bf16.mxu0 %v1611_v14 }
  0x76   :  { %1614 = vmatpush3.bf16.msra.mxu0 %v1611_v14 }
  0x77   :  { %1616 = vmatprep.subr.bf16.mxu0 %v1615_v18 }
  0x79   :  { %1324 = vmatmul.mubr.f32.vlgmr.msra.gmra.mrb[0].mxu0 %v2019_v11  ;;  %v1631_v11 = vpack.c.bf16 %v327_v35, %v326_v34  ;;  %v626_v34 = vld [vmem:[#allocation7 + $0x80] sm:$0xff]  ;;  %v627_v35 = vld [vmem:[#allocation7 + $0x88] sm:$0xff] }
  0x7a   :  { %1618 = vmatpush3.bf16.msra.mxu0 %v1615_v18  ;;  %1326 = vmatprep.mubr.f32.mxu0 %v2030_v20  ;;  %v1635_v20 = vpack.c.bf16 %v329_v38, %v328_v36  ;;  %v628_v36 = vld [vmem:[#allocation7 + $0x90] sm:$0xff]  ;;  %v629_v38 = vld [vmem:[#allocation7 + $0x98] sm:$0xff] }
  0x7b   :  { %1620 = vmatprep.subr.bf16.mxu0 %v1619_v23 }
  0x7d   :  { %1327 = vmatmul.mubr.f32.gmra.mrb[2].mxu0 %v2035_v21  ;;  %v332_v21 = vld [vmem:[#allocation4 + $0x170] sm:$0xff] }
  0x7e   :  { %1622 = vmatpush3.bf16.msra.mxu0 %v1619_v23  ;;  %1361 = vmatprep.mubr.f32.mxu0 %v305_v31  ;;  %v1643_v45 = vpack.c.bf16 %v333_v43, %v332_v21  ;;  %v632_v21 = vld [vmem:[#allocation7 + $0xb0] sm:$0xff]  ;;  %v633_v43 = vld [vmem:[#allocation7 + $0xb8] sm:$0xff] }
  0x7f   :  { %1624 = vmatprep.subr.bf16.mxu0 %v1623_v28 }
  0x82   :  { %1626 = vmatpush3.bf16.msra.mxu0 %v1623_v28 }
  0x83   :  { %1628 = vmatprep.subr.bf16.mxu0 %v1627_v10 }
  0x86   :  { %1630 = vmatpush3.bf16.msra.mxu0 %v1627_v10 }
  0x87   :  { %1632 = vmatprep.subr.bf16.mxu0 %v1631_v11 }
  0x8a   :  { %1634 = vmatpush3.bf16.msra.mxu0 %v1631_v11  ;;  %v1671_v11 = vpack.c.bf16 %v627_v35, %v626_v34 }
  0x8b   :  { %1636 = vmatprep.subr.bf16.mxu0 %v1635_v20 }
  0x8e   :  { %1638 = vmatpush3.bf16.msra.mxu0 %v1635_v20  ;;  %v1675_v20 = vpack.c.bf16 %v629_v38, %v628_v36  ;;  %v591_v36 = vld [vmem:[#allocation7 + $0x10] sm:$0xff]  ;;  %v592_v38 = vld [vmem:[#allocation7 + $0x18] sm:$0xff] }
  0x8f   :  { %1640 = vmatprep.subr.bf16.mxu0 %v1639_v42 }
  0x92   :  { %1642 = vmatpush3.bf16.msra.mxu0 %v1639_v42  ;;  %v1679_v42 = vpack.c.bf16 %v631_v41, %v630_v39 }
  0x93   :  { %1644 = vmatprep.subr.bf16.mxu0 %v1643_v45 }
  0x96   :  { %1646 = vmatpush3.bf16.msra.mxu0 %v1643_v45  ;;  %v1683_v45 = vpack.c.bf16 %v633_v43, %v632_v21 }
  0x97   :  { %1767 = vmatprep.subr.bf16.mxu0 %v1919_v0 }
  0x99   :  { %1362 = vmatmul.mubr.f32.vlgmr.msra.gmra.mrb[0].mxu0 %v307_v47  ;;  %v635_v47 = vld [vmem:[#allocation7 + $0xc8] sm:$0xff] }
  0x9a   :  { %1364 = vmatprep.mubr.f32.mxu0 %v2043_v29  ;;  %1769 = vmatpush3.bf16.msra.mxu0 %v2048_v37  ;;  %v1657_v29 = vpack.c.bf16 %v456_v51, %v455_v50  ;;  %v458_v37 = vld [vmem:[#allocation9 + $0x48] sm:$0xff]  ;;  %v1687_v44 = vpack.c.bf16 %v635_v47, %v634_v46  ;;  %v638_v51 = vld [vmem:[#allocation7 + $0xe0] sm:$0xff] }
  0x9b   :  { %1770 = vmatprep.subr.bf16.mxu0 %v1919_v0 }
  0x9c   :  { %1658 = vmatpush3.bf16.msra.mxu1 %v1657_v29 }
  0x9d   :  { %1365 = vmatmul.mubr.f32.gmra.mrb[2].mxu0 %v2046_v30  ;;  %1659 = vmatprep.subr.bf16.mxu1 %v1919_v0  ;;  %v457_v30 = vld [vmem:[#allocation9 + $0x40] sm:$0xff] }
  0x9e   :  { %1772 = vmatpush3.bf16.msra.mxu0 %v2051_v40  ;;  %v1660_v40 = vpack.c.bf16 %v458_v37, %v457_v30  ;;  %1548 = vmatprep.mubr.msk.f32.mxu0 %vm1920_vm2, %v1921_v63  ;;  %v640_v30 = vld [vmem:[#allocation7 + $0xf0] sm:$0xff] }
  0x9f   :  { %1773 = vmatprep.subr.bf16.mxu0 %v1919_v0 }
  0xa0   :  { %1661 = vmatpush3.bf16.msra.mxu1 %v1660_v40 }
  0xa1   :  { %1662 = vmatprep.subr.bf16.mxu1 %v1919_v0 }
  0xa2   :  { %1775 = vmatpush3.bf16.msra.mxu0 %v1654_v49  ;;  %v637_v49 = vld [vmem:[#allocation7 + $0xd8] sm:$0xff] }
  0xa3   :  { %1776 = vmatprep.subr.bf16.mxu0 %v1919_v0  ;;  %v1691_v50 = vpack.c.bf16 %v637_v49, %v636_v48 }
  0xa4   :  { %1664 = vmatpush3.bf16.msra.mxu1 %v1663_v55 }
  0xa5   :  { %1665 = vmatprep.subr.bf16.mxu1 %v1919_v0 }
  0xa6   :  { %1778 = vmatpush3.bf16.msra.mxu0 %v1657_v29  ;;  %v639_v29 = vld [vmem:[#allocation7 + $0xe8] sm:$0xff] }
  0xa7   :  { %1779 = vmatprep.subr.bf16.mxu0 %v1919_v0  ;;  %v1695_v37 = vpack.c.bf16 %v639_v29, %v638_v51  ;;  %v1707_v51 = vpack.c.bf16 %v592_v38, %v591_v36  ;;  %v837_v38 = vld [vmem:[#allocation7 + $0x150] sm:$0xff] }
  0xa8   :  { %1667 = vmatpush3.bf16.msra.mxu1 %v1666_v60 }
  0xa9   :  { %1668 = vmatprep.subr.bf16.mxu1 %v1919_v0 }
  0xaa   :  { %1781 = vmatpush3.bf16.msra.mxu0 %v1660_v40  ;;  %v641_v40 = vld [vmem:[#allocation7 + $0xf8] sm:$0xff] }
  0xab   :  { %1782 = vmatprep.subr.bf16.mxu0 %v1919_v0  ;;  %v1699_v52 = vpack.c.bf16 %v641_v40, %v640_v30  ;;  %v594_v40 = vld [vmem:[#allocation7 + $0x28] sm:$0xff] }
  0xac   :  { %1670 = vmatpush3.bf16.msra.mxu1 %v1669_v1 }
  0xad   :  { %1672 = vmatprep.subr.bf16.mxu1 %v1671_v11 }
  0xae   :  { %1784 = vmatpush3.bf16.msra.mxu0 %v1663_v55  ;;  %v590_v55 = vld [vmem:[#allocation7 + $0x8] sm:$0xff] }
  0xaf   :  { %1785 = vmatprep.subr.bf16.mxu0 %v1919_v0  ;;  %v2123_v57 = vpack.c.bf16 %v590_v55, %v589_v54 }
  0xb2   :  { %1787 = vmatpush3.bf16.msra.mxu0 %v1666_v60 }
  0xb3   :  { %1788 = vmatprep.subr.bf16.mxu0 %v1919_v0 }
  0xb6   :  { %1790 = vmatpush3.bf16.msra.mxu0 %v1669_v1 }
 0x16c   :  { %v2102_v2 = vpop.f32.mrb[0].mxu0 }
 0x16d   :  { %v435_v3 = vmul.f32 %v2102_v2, %v2102_v2  ;;  %v2106_v4 = vpop.f32.mrb[1].mxu0 }
 0x16e   :  { %v425_v5 = vadd.f32 %v2102_v2, %v2106_v4  ;;  %v434_v6 = vmul.f32 %v2106_v4, %v2106_v4 }
 0x170   :  { %v438_v7 = vadd.f32 %v435_v3, %v434_v6  ;;  %v2112_v8 = vpop.f32.mrb[2].mxu0 }
 0x171   :  { %v2114_v9 = vpop.f32.mrb[3].mxu0  ;;  %v437_v13 = vmul.f32 %v2112_v8, %v2112_v8 }
 0x172   :  { %v426_v0 = vadd.f32 %v425_v5, %v2114_v9  ;;  %v436_v12 = vmul.f32 %v2114_v9, %v2114_v9  ;;  %v549_v5 = vlaneseq }
 0x174   :  { %v427_v14 = vadd.f32 %v2112_v8, %v426_v0  ;;  %v439_v15 = vadd.f32 %v438_v7, %v436_v12  ;;  %v550_v6 = vshrl.u32 %v549_v5, 7  ;;  %v423_v0 = vld [vmem:[%s2214_s4] sm:$0x1]  ;;  %v598_v5 = vld [vmem:[#allocation7 + $0x48] sm:$0xff] }
 0x176   :  { %v428_v17 = vrot.slane %v427_v14, 4  ;;  %v440_v18 = vadd.f32 %v439_v15, %v437_v13  ;;  %v2129_v13 = vsub.s32 0, %v550_v6  ;;  %v424_v15 = vld [vmem:[%s2214_s4 + $0x1] sm:$0x1] }
 0x178   :  { %v429_v19 = vadd.f32 %v428_v17, %v427_v14  ;;  %v441_v22 = vrot.slane %v440_v18, 4 }
 0x17a   :  { %v430_v23 = vrot.slane %v429_v19, 2  ;;  %v442_v24 = vadd.f32 %v441_v22, %v440_v18 }
 0x17c   :  { %v431_v25 = vadd.f32 %v430_v23, %v429_v19  ;;  %v443_v26 = vrot.slane %v442_v24, 2 }
 0x17e   :  { %v432_v27 = vrot.slane %v431_v25, 1  ;;  %v444_v28 = vadd.f32 %v443_v26, %v442_v24 }
 0x180   :  { %v445_v31 = vrot.slane %v444_v28, 1  ;;  %v433_v32 = vadd.f32 %v432_v27, %v431_v25  ;;  %v570_v27 = vstv %s2215_s5 }
 0x182   :  { %v446_v33 = vadd.f32 %v445_v31, %v444_v28 }
 0x184   :  { %v448_v10 = vsel %vm447_vm3, %v433_v32, %v446_v33 }
 0x185   :  { %1400 = vmatmul.mubr.f32.vlgmr.msra.gmra.mrb[0].mxu1 %v448_v10 }
 0x186   :  { %1674 = vmatpush3.bf16.msra.mxu1 %v1671_v11 }
 0x187   :  { %1676 = vmatprep.subr.bf16.mxu1 %v1675_v20 }
 0x18a   :  { %1678 = vmatpush3.bf16.msra.mxu1 %v1675_v20 }
 0x18b   :  { %1680 = vmatprep.subr.bf16.mxu1 %v1679_v42 }
 0x18e   :  { %1682 = vmatpush3.bf16.msra.mxu1 %v1679_v42 }
 0x18f   :  { %1684 = vmatprep.subr.bf16.mxu1 %v1683_v45 }
 0x192   :  { %1686 = vmatpush3.bf16.msra.mxu1 %v1683_v45 }
 0x193   :  { %1688 = vmatprep.subr.bf16.mxu1 %v1687_v44 }
 0x196   :  { %1690 = vmatpush3.bf16.msra.mxu1 %v1687_v44 }
 0x197   :  { %1692 = vmatprep.subr.bf16.mxu1 %v1691_v50 }
 0x19a   :  { %1694 = vmatpush3.bf16.msra.mxu1 %v1691_v50 }
 0x19b   :  { %1696 = vmatprep.subr.bf16.mxu1 %v1695_v37 }
 0x19e   :  { %1698 = vmatpush3.bf16.msra.mxu1 %v1695_v37  ;;  %v593_v37 = vld [vmem:[#allocation7 + $0x20] sm:$0xff] }
 0x19f   :  { %1700 = vmatprep.subr.bf16.mxu1 %v1699_v52 }
 0x1a2   :  { %1702 = vmatpush3.bf16.msra.mxu1 %v1699_v52 }
 0x1a3   :  { %1704 = vmatprep.subr.bf16.mxu1 %v2123_v57 }
 0x258   :  { %v531_v58 = vpop.f32.mrb[0].mxu1 }
 0x259   :  { %v535_v60 = vmul.f32 0.001953125, %v531_v58  ;;  %v1401_v61 = vpop.f32.mrb[1].mxu1 }
 0x25b   :  { %v536_v62 = vmul.f32 %v535_v60, %v535_v60 }
 0x25d   :  { %v538_v63 = vrot.slane %v536_v62, 7 }
 0x25f   :  { %v540_v1 = vsub.f32 %v535_v60, %v538_v63  ;;  %v595_v63 = vld [vmem:[#allocation7 + $0x30] sm:$0xff] }
 0x261   :  { %v541_v3 = vadd.f32 1e-05, %v540_v1  ;;  %v596_v1 = vld [vmem:[#allocation7 + $0x38] sm:$0xff] }
 0x263   :  { %1816 = vrsqrt.f32 %v541_v3  ;;  %v1715_v3 = vpack.c.bf16 %v596_v1, %v595_v63 }
 0x26d   :  { %v1817_v7 = vpop.eup %1816 }
 0x26e   :  { %v544_v12 = vrot.slane %v1817_v7, 1  ;;  %v599_v7 = vld [vmem:[#allocation7 + $0x50] sm:$0xff] }
 0x270   :  { %v546_v14 = vmul.f32 %v544_v12, %v423_v0  ;;  %v600_v0 = vld [vmem:[#allocation7 + $0x58] sm:$0xff] }
 0x271   :  { %v1723_v12 = vpack.c.bf16 %v600_v0, %v599_v7 }
 0x272   :  { %v547_v17 = vmul.f32 %v546_v14, %v535_v60  ;;  %v552_v18 = vrot.slane %v546_v14, %v2129_v13  ;;  %v1711_v60 = vpack.c.bf16 %v594_v40, %v593_v37  ;;  %v601_v14 = vld [vmem:[#allocation7 + $0x60] sm:$0xff] }
 0x274   :  { %v548_v19 = vsub.f32 %v424_v15, %v547_v17  ;;  %v553_v22 = vmul.f32 %v552_v18, %v2106_v4  ;;  %v554_v23 = vmul.f32 %v2102_v2, %v552_v18  ;;  %v555_v24 = vmul.f32 %v552_v18, %v2114_v9  ;;  %v602_v15 = vld [vmem:[#allocation7 + $0x68] sm:$0xff] }
 0x275   :  { %v556_v25 = vmul.f32 %v2112_v8, %v552_v18  ;;  %v1727_v17 = vpack.c.bf16 %v602_v15, %v601_v14  ;;  %v603_v18 = vld [vmem:[#allocation7 + $0x70] sm:$0xff] }
 0x276   :  { %v560_v26 = vrot.slane %v548_v19, %v2129_v13  ;;  %v604_v19 = vld [vmem:[#allocation7 + $0x78] sm:$0xff] }
 0x278   :  { %v561_v28 = vadd.f32 %v560_v26, %v553_v22  ;;  %v562_v31 = vadd.f32 %v560_v26, %v554_v23  ;;  %v563_v32 = vadd.f32 %v560_v26, %v555_v24  ;;  %v564_v33 = vadd.f32 %v560_v26, %v556_v25  ;;  %v827_v23 = vld [vmem:[#allocation7 + $0x100] sm:$0xff]  ;;  %v828_v24 = vld [vmem:[#allocation7 + $0x108] sm:$0xff]  ;;  %v829_v26 = vld [vmem:[#allocation7 + $0x110] sm:$0xff] }
 0x279   :  { %v1731_v22 = vpack.c.bf16 %v604_v19, %v603_v18  ;;  %v1735_v25 = vpack.c.bf16 %v828_v24, %v827_v23 }
 0x27a   :  { %vm566_vm4 = vcmp.gt.f32.partialorder %v561_v28, 0.0  ;;  %vm567_vm5 = vcmp.gt.f32.partialorder %v562_v31, 0.0  ;;  %vm568_vm6 = vcmp.gt.f32.partialorder %v563_v32, 0.0  ;;  %vm569_vm7 = vcmp.gt.f32.partialorder %v564_v33, 0.0 }
 0x27b   :  { %v571_v4 = vmul.f32 %v570_v27, %v561_v28  ;;  %v572_v2 = vmul.f32 %v570_v27, %v562_v31  ;;  %v573_v10 = vmul.f32 %v570_v27, %v563_v32  ;;  %v574_v9 = vmul.f32 %v570_v27, %v564_v33  ;;  %v830_v27 = vld [vmem:[#allocation7 + $0x118] sm:$0xff] }
 0x27d   :  { %v575_v34 = vsel %vm566_vm4, %v561_v28, %v571_v4  ;;  %v576_v8 = vsel %vm567_vm5, %v562_v31, %v572_v2  ;;  %v577_v35 = vsel %vm568_vm6, %v563_v32, %v573_v10  ;;  %v578_v11 = vsel %vm569_vm7, %v564_v33, %v574_v9  ;;  %v831_v31 = vld [vmem:[#allocation7 + $0x120] sm:$0xff]  ;;  %v832_v32 = vld [vmem:[#allocation7 + $0x128] sm:$0xff]  ;;  %v833_v10 = vld [vmem:[#allocation7 + $0x130] sm:$0xff] }
 0x27e   :  { %579 = vst [vmem:[#allocation2 + $0x1] sm:$0xff] %v575_v34  ;;  %580 = vst [vmem:[#allocation2 + $0x9] sm:$0xff] %v576_v8  ;;  %v1739_v28 = vpack.c.bf16 %v830_v27, %v829_v26  ;;  %v1743_v2 = vpack.c.bf16 %v832_v32, %v831_v31  ;;  %v834_v9 = vld [vmem:[#allocation7 + $0x138] sm:$0xff] }
 0x27f   :  { %581 = vst [vmem:[#allocation2 + $0x19] sm:$0xff] %v577_v35  ;;  %582 = vst [vmem:[#allocation2 + $0x21] sm:$0xff] %v578_v11  ;;  %v1747_v8 = vpack.c.bf16 %v834_v9, %v833_v10  ;;  %v835_v35 = vld [vmem:[#allocation7 + $0x140] sm:$0xff]  ;;  %v836_v11 = vld [vmem:[#allocation7 + $0x148] sm:$0xff] }
 0x280   :  { %v1751_v36 = vpack.c.bf16 %v836_v11, %v835_v35 }
 0x285   :  { %v2143_v20 = vld [vmem:[#allocation2] sm:$0xff]  ;;  %v2145_v39 = vld [vmem:[#allocation2 + $0x8] sm:$0xff]  ;;  %v2147_v41 = vld [vmem:[#allocation2 + $0x10] sm:$0x3] }
 0x286   :  { %v611_v42 = vrot.slane %v2143_v20, 1  ;;  %v612_v21 = vrot.slane %v2145_v39, 1  ;;  %v614_v43 = vrot.slane %v2147_v41, 1  ;;  %v2152_v45 = vld [vmem:[#allocation2 + $0x18] sm:$0xff]  ;;  %v2154_v46 = vld [vmem:[#allocation2 + $0x20] sm:$0xff]  ;;  %v812_v33 = vrot.slane %v2143_v20, 2 }
 0x287   :  { %v616_v47 = vrot.slane %v2152_v45, 1  ;;  %v617_v44 = vrot.slane %v2154_v46, 1  ;;  %v588_v48 = vld [vmem:[#allocation2 + $0x28] sm:$0x3]  ;;  %v817_v29 = vrot.slane %v2152_v45, 2  ;;  %v818_v52 = vrot.slane %v2154_v46, 2 }
 0x288   :  { %v613_v49 = vsel %vm100_vm0, %v611_v42, %v612_v21  ;;  %v615_v50 = vsel %vm100_vm0, %v612_v21, %v614_v43  ;;  %v619_v30 = vrot.slane %v588_v48, 1  ;;  %v820_v55 = vrot.slane %v588_v48, 2  ;;  %v839_v42 = vld [vmem:[#allocation7 + $0x160] sm:$0xff]  ;;  %v840_v21 = vld [vmem:[#allocation7 + $0x168] sm:$0xff] }
 0x289   :  { %1434 = vmatprep.mubr.f32.mxu1 %v613_v49  ;;  %v618_v54 = vsel %vm100_vm0, %v616_v47, %v617_v44  ;;  %v2165_v58 = vsel %vm302_vm1, %v817_v29, %v818_v52  ;;  %v813_v4 = vrot.slane %v2145_v39, 2  ;;  %v1759_v43 = vpack.c.bf16 %v840_v21, %v839_v42 }
 0x28a   :  { %1435 = vmatmul.mubr.f32.vlgmr.msra.gmra.mrb[2].mxu1 %v615_v50  ;;  %v2168_v61 = vsel %vm302_vm1, %v818_v52, %v820_v55  ;;  %v620_v62 = vsel %vm100_vm0, %v617_v44, %v619_v30  ;;  %v815_v44 = vrot.slane %v2147_v41, 2 }
 0x28b   :  { %1706 = vmatpush3.bf16.msra.mxu1 %v2123_v57  ;;  %1437 = vmatprep.mubr.f32.mxu1 %v618_v54  ;;  %v597_v57 = vld [vmem:[#allocation7 + $0x40] sm:$0xff]  ;;  %v814_v34 = vsel %vm302_vm1, %v812_v33, %v813_v4  ;;  %v933_v33 = vld [vmem:[%s2214_s4 + $0x3] sm:$0x1] }
 0x28c   :  { %1708 = vmatprep.subr.bf16.mxu1 %v1707_v51  ;;  %v1719_v6 = vpack.c.bf16 %v598_v5, %v597_v57  ;;  %v816_v48 = vsel %vm302_vm1, %v813_v4, %v815_v44 }
 0x28e   :  { %1438 = vmatmul.mubr.f32.gmra.mrb[4].mxu1 %v620_v62 }
 0x28f   :  { %1710 = vmatpush3.bf16.msra.mxu1 %v1707_v51  ;;  %1472 = vmatprep.mubr.f32.mxu1 %v2143_v20  ;;  %v838_v20 = vld [vmem:[#allocation7 + $0x158] sm:$0xff] }
 0x290   :  { %1712 = vmatprep.subr.bf16.mxu1 %v1711_v60 }
 0x293   :  { %1714 = vmatpush3.bf16.msra.mxu1 %v1711_v60 }
 0x294   :  { %1716 = vmatprep.subr.bf16.mxu1 %v1715_v3 }
 0x297   :  { %1718 = vmatpush3.bf16.msra.mxu1 %v1715_v3 }
 0x298   :  { %1720 = vmatprep.subr.bf16.mxu1 %v1719_v6 }
 0x29b   :  { %1722 = vmatpush3.bf16.msra.mxu1 %v1719_v6 }
 0x29c   :  { %1724 = vmatprep.subr.bf16.mxu1 %v1723_v12 }
 0x29f   :  { %1726 = vmatpush3.bf16.msra.mxu1 %v1723_v12 }
 0x2a0   :  { %1728 = vmatprep.subr.bf16.mxu1 %v1727_v17 }
 0x2a3   :  { %1730 = vmatpush3.bf16.msra.mxu1 %v1727_v17 }
 0x2a4   :  { %1732 = vmatprep.subr.bf16.mxu1 %v1731_v22 }
 0x2a7   :  { %1734 = vmatpush3.bf16.msra.mxu1 %v1731_v22 }
 0x2a8   :  { %1736 = vmatprep.subr.bf16.mxu1 %v1735_v25 }
 0x2aa   :  { %1473 = vmatmul.mubr.f32.vlgmr.msra.gmra.mrb[2].mxu1 %v2145_v39  ;;  %v1755_v39 = vpack.c.bf16 %v838_v20, %v837_v38 }
 0x2ab   :  { %1475 = vmatprep.mubr.f32.mxu1 %v2152_v45  ;;  %1738 = vmatpush3.bf16.msra.mxu1 %v1735_v25  ;;  %v841_v45 = vld [vmem:[#allocation7 + $0x170] sm:$0xff] }
 0x2ac   :  { %1740 = vmatprep.subr.bf16.mxu1 %v1739_v28 }
 0x2ae   :  { %1476 = vmatmul.mubr.f32.gmra.mrb[4].mxu1 %v2154_v46  ;;  %v842_v46 = vld [vmem:[#allocation7 + $0x178] sm:$0xff] }
 0x2af   :  { %1742 = vmatpush3.bf16.msra.mxu1 %v1739_v28  ;;  %1510 = vmatprep.mubr.f32.mxu1 %v814_v34  ;;  %v1763_v47 = vpack.c.bf16 %v842_v46, %v841_v45  ;;  %v932_v28 = vld [vmem:[%s2214_s4 + $0x2] sm:$0x1]  ;;  %s1886_s4 = scalar_lea.vmem %s1087_s7, 512 }
 0x2b0   :  { %1744 = vmatprep.subr.bf16.mxu1 %v1743_v2  ;;  %p1887_p10 = scmp.ne.s32.totalorder %s1087_s7, %s1886_s4  ;;  %p1892_p12 = scmp.lt.s32.totalorder %s1886_s4, %s1886_s4 }
 0x2b2   :  { %p1893_p13 = por %p1892_p12, %p1891_p11 }
 0x2b3   :  { %1746 = vmatpush3.bf16.msra.mxu1 %v1743_v2 }
 0x2b4   :  { %1748 = vmatprep.subr.bf16.mxu1 %v1747_v8  ;;  %p1894_p0 = pnand %p1893_p13, %p1887_p10 }
 0x2b7   :  { %1750 = vmatpush3.bf16.msra.mxu1 %v1747_v8 }
 0x2b8   :  { %1752 = vmatprep.subr.bf16.mxu1 %v1751_v36 }
 0x2bb   :  { %1754 = vmatpush3.bf16.msra.mxu1 %v1751_v36 }
 0x2bc   :  { %1756 = vmatprep.subr.bf16.mxu1 %v1755_v39 }
 0x2bf   :  { %1758 = vmatpush3.bf16.msra.mxu1 %v1755_v39 }
 0x2c0   :  { %1760 = vmatprep.subr.bf16.mxu1 %v1759_v43 }
 0x2c3   :  { %1762 = vmatpush3.bf16.msra.mxu1 %v1759_v43 }
 0x2c4   :  { %1764 = vmatprep.subr.bf16.mxu1 %v1763_v47 }
 0x2c7   :  { %1766 = vmatpush3.bf16.msra.mxu1 %v1763_v47 }
 0x2ca   :  { %1511 = vmatmul.mubr.f32.vlgmr.msra.gmra.mrb[2].mxu1 %v816_v48 }
 0x2cb   :  { %1513 = vmatprep.mubr.f32.mxu1 %v2165_v58 }
 0x2ce   :  { %1514 = vmatmul.mubr.f32.gmra.mrb[4].mxu1 %v2168_v61 }
 0x39d   :  { %v1512_v49 = vpop.f32.mrb[2].mxu1 }
 0x39e   :  { %v944_v50 = vmul.f32 %v1512_v49, %v1512_v49  ;;  %v909_v51 = vpop.f32.mrb[3].mxu1 }
 0x39f   :  { %v934_v29 = vadd.f32 %v1512_v49, %v909_v51  ;;  %v943_v30 = vmul.f32 %v909_v51, %v909_v51 }
 0x3a1   :  { %v947_v37 = vadd.f32 %v944_v50, %v943_v30  ;;  %v1515_v40 = vpop.f32.mrb[4].mxu1 }
 0x3a2   :  { %v919_v52 = vpop.f32.mrb[5].mxu1  ;;  %v946_v60 = vmul.f32 %v1515_v40, %v1515_v40 }
 0x3a3   :  { %v935_v54 = vadd.f32 %v934_v29, %v919_v52  ;;  %v945_v55 = vmul.f32 %v919_v52, %v919_v52 }
 0x3a5   :  { %v936_v41 = vadd.f32 %v1515_v40, %v935_v54  ;;  %v948_v62 = vadd.f32 %v947_v37, %v945_v55 }
 0x3a7   :  { %v937_v63 = vrot.slane %v936_v41, 4  ;;  %v949_v1 = vadd.f32 %v948_v62, %v946_v60 }
 0x3a9   :  { %v938_v3 = vadd.f32 %v937_v63, %v936_v41  ;;  %v950_v57 = vrot.slane %v949_v1, 4 }
 0x3ab   :  { %v939_v58 = vrot.slane %v938_v3, 2  ;;  %v951_v5 = vadd.f32 %v950_v57, %v949_v1 }
 0x3ad   :  { %v940_v61 = vadd.f32 %v939_v58, %v938_v3  ;;  %v952_v6 = vrot.slane %v951_v5, 2 }
 0x3af   :  { %v941_v7 = vrot.slane %v940_v61, 1  ;;  %v953_v0 = vadd.f32 %v952_v6, %v951_v5 }
 0x3b1   :  { %v954_v12 = vrot.slane %v953_v0, 1  ;;  %v942_v14 = vadd.f32 %v941_v7, %v940_v61 }
 0x3b3   :  { %v955_v15 = vadd.f32 %v954_v12, %v953_v0 }
 0x3b5   :  { %v956_v17 = vsel %vm447_vm3, %v942_v14, %v955_v15 }
 0x3b6   :  { %1549 = vmatmul.mubr.f32.vlgmr.msra.gmra.mrb[4].mxu0 %v956_v17 }
 0x489   :  { %v1039_v18 = vpop.f32.mrb[4].mxu0 }
 0x48a   :  { %v1043_v19 = vmul.f32 0.001953125, %v1039_v18  ;;  %v1550_v22 = vpop.f32.mrb[5].mxu0 }
 0x48c   :  { %v1044_v23 = vmul.f32 %v1043_v19, %v1043_v19 }
 0x48e   :  { %v1046_v24 = vrot.slane %v1044_v23, 7 }
 0x490   :  { %v1048_v25 = vsub.f32 %v1043_v19, %v1046_v24 }
 0x492   :  { %v1049_v26 = vadd.f32 1e-05, %v1048_v25 }
 0x494   :  { %1818 = vrsqrt.f32 %v1049_v26 }
 0x49e   :  { %v1819_v27 = vpop.eup %1818 }
 0x49f   :  { %v1052_v31 = vrot.slane %v1819_v27, 1 }
 0x4a1   :  { %v1054_v32 = vmul.f32 %v1052_v31, %v932_v28 }
 0x4a3   :  { %v1055_v4 = vmul.f32 %v1054_v32, %v1043_v19  ;;  %v1060_v2 = vrot.slane %v1054_v32, %v2129_v13 }
 0x4a5   :  { %v1056_v10 = vsub.f32 %v933_v33, %v1055_v4  ;;  %v1061_v9 = vmul.f32 %v1060_v2, %v909_v51  ;;  %v1062_v34 = vmul.f32 %v1512_v49, %v1060_v2  ;;  %v1063_v8 = vmul.f32 %v1060_v2, %v919_v52 }
 0x4a6   :  { %v1064_v35 = vmul.f32 %v1515_v40, %v1060_v2 }
 0x4a7   :  { %v1068_v11 = vrot.slane %v1056_v10, %v2129_v13 }
 0x4a9   :  { %v1069_v36 = vadd.f32 %v1068_v11, %v1061_v9  ;;  %v1070_v38 = vadd.f32 %v1068_v11, %v1062_v34  ;;  %v1071_v20 = vadd.f32 %v1068_v11, %v1063_v8  ;;  %v1072_v39 = vadd.f32 %v1068_v11, %v1064_v35 }
 0x4ab   :  { %v1073_v42 = vadd.f32 %v1069_v36, %v2024_v16  ;;  %v1074_v21 = vadd.f32 %v1070_v38, %v2065_v53  ;;  %v1075_v43 = vadd.f32 %v1071_v20, %v2068_v56  ;;  %v1076_v45 = vadd.f32 %v1072_v39, %v2073_v59 }
 0x4ad   :  { %1077 = vst [vmem:[#allocation10] sm:$0xff] %v1073_v42  ;;  %1078 = vst [vmem:[#allocation10 + $0x8] sm:$0xff] %v1074_v21 }
 0x4ae   :  { %1079 = vst [vmem:[#allocation10 + $0x10] sm:$0xff] %v1075_v43  ;;  %1080 = vst [vmem:[#allocation10 + $0x18] sm:$0xff] %v1076_v45 }
 0x4af   :  { %1897 = shalt.err (!%p1894_p0)
}
 0x4b0   :  { %s1898_s24 = scalar_lea.hbm %s2216_s6, 512 }
 0x4b1   :  { %p1899_p1 = scmp.ne.s32.totalorder %s2216_s6, %s1898_s24  ;;  %p1902_p2 = scmp.lt.u32.totalorder %s1898_s24, %s2216_s6 }
 0x4b3   :  { %p1904_p3 = pnand %p1902_p2, %p1899_p1 }
 0x4b5   :  { %1907 = shalt.err (!%p1904_p3)
}
 0x4b6   :  { %1092 = dma.vmem_to_hbm [thread:$0]  %s1087_s7, 512, %s2216_s6, [#allocation6], %s1916_s9, %s1916_s9, %s1917_s10  }
 0x4b7   :  { %1912 = dma.done.wait [#allocation6], 512  }
 0x4b8   :  { %1913 = vsyncadd [#allocation6], 4294966784 }
 0x4b9   :  { %1096 = vsyncpa [#allocation5], 1 }
 0x4ba   :  { %1097 = vsyncpa [#allocation8], 1 }
 0x4bb   :  { %1098 = vsyncpa [#allocation6], 1 }

</bundles_post_ra>
